<compile_context>
chip_gen: v5e
topology: v5e:2x2
jax: 0.10.0
libtpu: 0.0.40
codegen_flags: <defaults>
</compile_context>

<pallas_src>
import math

import jax
import jax.numpy as jnp
from jax.experimental import pallas as pl
from jax.experimental.pallas import tpu as pltpu

NEG = -1e30  # stands in for MaxPool1d's -inf padding


# ---------------------------- fused conv section ----------------------------

def _conv_section_kernel(a_ref, b_ref, w_ref, bias_ref, ma_ref, mb_ref,
                         sc_ref, sh_ref, o_ref):
    # a_ref/b_ref: (Cin*K, Lpool) patch columns for the two pool partners.
    # Conv as matmul, bias, ReLU, pool(max of the two partners), BN affine.
    w = w_ref[...]
    bias = bias_ref[...]
    ya = jnp.maximum(jnp.dot(w, a_ref[...], preferred_element_type=jnp.float32)
                     + bias, 0.0) + ma_ref[...]
    yb = jnp.maximum(jnp.dot(w, b_ref[...], preferred_element_type=jnp.float32)
                     + bias, 0.0) + mb_ref[...]
    o_ref[...] = jnp.maximum(ya, yb) * sc_ref[...] + sh_ref[...]


def conv_section(x, w, b, bn_scale, bn_shift, *, stride, conv_pad, pool_pad):
    """Conv1d -> ReLU -> MaxPool1d(2, padding=pool_pad) -> BatchNorm1d (eval)."""
    B, Cin, L = x.shape
    Cout, _, K = w.shape
    Lc = (L + 2 * conv_pad - K) // stride + 1
    Lpool = (Lc + 2 * pool_pad - 2) // 2 + 1
    CinK = Cin * K

    # im2col via K shifted strided slices (no gather): patches (B, Cin*K, Lc)
    xp = jnp.pad(x, ((0, 0), (0, 0), (conv_pad, conv_pad)))
    cols = [xp[:, :, k: k + (Lc - 1) * stride + 1: stride] for k in range(K)]
    patches = jnp.stack(cols, axis=2).reshape(B, CinK, Lc)

    # Split conv output columns into the two MaxPool partners (even/odd within
    # the pool-padded sequence). Out-of-range positions get a -1e30 mask so the
    # max always picks the valid partner (exact MaxPool -inf-pad semantics).
    need = 2 * Lpool
    right = max(0, need - (Lc + pool_pad))
    pp = jnp.pad(patches, ((0, 0), (0, 0), (pool_pad, right)))
    a_cols = pp[:, :, 0:need:2]        # conv positions 2j - pool_pad
    b_cols = pp[:, :, 1:need:2]        # conv positions 2j + 1 - pool_pad

    mask_a = jnp.array([[0.0 if 0 <= 2 * j - pool_pad < Lc else NEG
                         for j in range(Lpool)]], jnp.float32)
    mask_b = jnp.array([[0.0 if 0 <= 2 * j + 1 - pool_pad < Lc else NEG
                         for j in range(Lpool)]], jnp.float32)

    w_flat = w.reshape(Cout, CinK)
    bias = b.reshape(Cout, 1)
    scale = bn_scale.reshape(Cout, 1)
    shift = bn_shift.reshape(Cout, 1)

    return pl.pallas_call(
        _conv_section_kernel,
        grid=(B,),
        in_specs=[
            pl.BlockSpec((None, CinK, Lpool), lambda i: (i, 0, 0)),
            pl.BlockSpec((None, CinK, Lpool), lambda i: (i, 0, 0)),
            pl.BlockSpec((Cout, CinK), lambda i: (0, 0)),
            pl.BlockSpec((Cout, 1), lambda i: (0, 0)),
            pl.BlockSpec((1, Lpool), lambda i: (0, 0)),
            pl.BlockSpec((1, Lpool), lambda i: (0, 0)),
            pl.BlockSpec((Cout, 1), lambda i: (0, 0)),
            pl.BlockSpec((Cout, 1), lambda i: (0, 0)),
        ],
        out_specs=pl.BlockSpec((None, Cout, Lpool), lambda i: (i, 0, 0)),
        out_shape=jax.ShapeDtypeStruct((B, Cout, Lpool), jnp.float32),
        compiler_params=pltpu.CompilerParams(dimension_semantics=("parallel",)),
    )(a_cols, b_cols, w_flat, bias, mask_a, mask_b, scale, shift)


# ---------------------------- fused biLSTM + head ----------------------------

def _tail_kernel(x_ref, wih_ref, whh_ref, bl_ref, w2_ref, b2_ref, w3_ref,
                 b3_ref, o_ref):
    # x_ref: (T*B, D) time-major flattened sequence (same data both directions).
    TB, D = x_ref.shape
    B = o_ref.shape[0]
    T = TB // B
    H = whh_ref.shape[1]
    x_flat = x_ref[...]

    # Hoisted input projection: one big matmul per direction, outside the loop.
    gxf = jnp.dot(x_flat, wih_ref[0], preferred_element_type=jnp.float32) + bl_ref[0]
    gxb = jnp.dot(x_flat, wih_ref[1], preferred_element_type=jnp.float32) + bl_ref[1]
    whh_f = whh_ref[0]
    whh_b = whh_ref[1]

    def cell(gates, c):
        i = jax.nn.sigmoid(gates[:, 0 * H:1 * H])
        f = jax.nn.sigmoid(gates[:, 1 * H:2 * H])
        g = jnp.tanh(gates[:, 2 * H:3 * H])
        o = jax.nn.sigmoid(gates[:, 3 * H:4 * H])
        c_new = f * c + i * g
        return o * jnp.tanh(c_new), c_new

    hf = jnp.zeros((B, H), jnp.float32)
    cf = jnp.zeros((B, H), jnp.float32)
    hb = jnp.zeros((B, H), jnp.float32)
    cb = jnp.zeros((B, H), jnp.float32)

    for t in range(T):  # T is tiny and static -> full unroll, static slices
        gf = gxf[t * B:(t + 1) * B, :] + jnp.dot(hf, whh_f,
                                                 preferred_element_type=jnp.float32)
        hf, cf = cell(gf, cf)
        tb = T - 1 - t
        gb = gxb[tb * B:(tb + 1) * B, :] + jnp.dot(hb, whh_b,
                                                   preferred_element_type=jnp.float32)
        hb, cb = cell(gb, cb)

    # concat([h_fwd, h_bwd], -1) @ W2 == h_fwd @ W2[:H] + h_bwd @ W2[H:]
    w2 = w2_ref[...]
    y = (jnp.dot(hf, w2[:H, :], preferred_element_type=jnp.float32)
         + jnp.dot(hb, w2[H:, :], preferred_element_type=jnp.float32)
         + b2_ref[...])
    # ELU (alpha = 1)
    y = jnp.where(y > 0, y, jnp.exp(jnp.minimum(y, 0.0)) - 1.0)
    # Dropout: identity at inference.
    o_ref[...] = jnp.dot(y, w3_ref[...], preferred_element_type=jnp.float32) + b3_ref[...]


def lstm_head(x_flat, B, wih, whh, bl, w2, b2, w3, b3):
    H = whh.shape[1]
    d2 = w2.shape[1]
    return pl.pallas_call(
        _tail_kernel,
        out_shape=jax.ShapeDtypeStruct((B, 1), jnp.float32),
    )(x_flat, wih, whh, bl.reshape(2, 1, 4 * H), w2, b2.reshape(1, d2),
      w3, b3.reshape(1, 1))


# ---------------------------- parameters / forward ----------------------------

def init_params(key, ks, cs, H, d2):
    params = {}
    chans = [1] + list(cs)
    keys = jax.random.split(key, 32)
    ki = 0
    convs = []
    eps = 1e-5
    for i in range(6):
        cin, cout, k = chans[i], chans[i + 1], ks[i]
        w = jax.random.normal(keys[ki], (cout, cin, k), jnp.float32) / math.sqrt(cin * k); ki += 1
        b = jax.random.normal(keys[ki], (cout,), jnp.float32) * 0.1; ki += 1
        # BatchNorm1d eval affine with PyTorch defaults (gamma=1, beta=0, rm=0, rv=1)
        scale = jnp.ones((cout,), jnp.float32) / jnp.sqrt(1.0 + eps)
        shift = jnp.zeros((cout,), jnp.float32)
        convs.append((w, b, scale, shift))
    params["convs"] = convs

    D = cs[-1]
    wih = jax.random.normal(keys[ki], (2, D, 4 * H), jnp.float32) / math.sqrt(D); ki += 1
    whh = jax.random.normal(keys[ki], (2, H, 4 * H), jnp.float32) / math.sqrt(H); ki += 1
    bl = jax.random.normal(keys[ki], (2, 4 * H), jnp.float32) * 0.1; ki += 1   # b_ih + b_hh
    params["lstm"] = (wih, whh, bl)

    w2 = jax.random.normal(keys[ki], (2 * H, d2), jnp.float32) / math.sqrt(2 * H); ki += 1
    b2 = jax.random.normal(keys[ki], (d2,), jnp.float32) * 0.1; ki += 1
    w3 = jax.random.normal(keys[ki], (d2, 1), jnp.float32) / math.sqrt(d2); ki += 1
    b3 = jax.random.normal(keys[ki], (1,), jnp.float32) * 0.1; ki += 1
    params["head"] = (w2, b2, w3, b3)
    return params


def cnn_forward(x, params, ks):
    k1 = ks[0]
    # Section configs mirror the PyTorch __init__ exactly (section 2's padding
    # really uses k1, as written in the reference model).
    section_cfg = [
        dict(stride=4, conv_pad=math.ceil((k1 - 4) / 2), pool_pad=0),
        dict(stride=2, conv_pad=math.ceil((k1 - 2) / 2), pool_pad=0),
        dict(stride=1, conv_pad=(ks[2] - 1) // 2, pool_pad=0),   # padding='same' (odd k)
        dict(stride=1, conv_pad=(ks[3] - 1) // 2, pool_pad=1),
        dict(stride=1, conv_pad=(ks[4] - 1) // 2, pool_pad=1),
        dict(stride=1, conv_pad=(ks[5] - 1) // 2, pool_pad=0),
    ]
    h = x
    for (w, b, sc, sh), cfg in zip(params["convs"], section_cfg):
        h = conv_section(h, w, b, sc, sh, **cfg)          # (B, C, L')

    # torch.transpose(x, 1, 2) -> (B, T, c6); kernel wants time-major (T*B, c6)
    B, c6, T = h.shape
    x_flat = jnp.transpose(h, (2, 0, 1)).reshape(T * B, c6)
    wih, whh, bl = params["lstm"]
    w2, b2, w3, b3 = params["head"]
    return lstm_head(x_flat, B, wih, whh, bl, w2, b2, w3, b3)   # (B, 1)


if __name__ == "__main__":
    # Hyperparameters (odd kernels for conv3..6 so padding='same' is symmetric).
    ks = (8, 5, 5, 3, 3, 3)          # k1..k6
    cs = (8, 8, 16, 16, 16, 16)      # c1..c6
    H = 16                           # lstm_n_hidden
    d2 = 32                          # dense2
    B, L = 2, 2048                   # input: (batch, 1 channel, signal length)

    key = jax.random.PRNGKey(0)
    kx, kp = jax.random.split(key)
    x = jax.random.normal(kx, (B, 1, L), jnp.float32)
    params = init_params(kp, ks, cs, H, d2)

    out = cnn_forward(x, params, ks)
    out = jax.block_until_ready(out)
    assert out.shape == (B, 1), out.shape
    assert bool(jnp.all(jnp.isfinite(out)))
    print("KERNEL_OK")
</pallas_src>

<mosaic_0001>
module attributes {stable_mosaic.version = 11 : i64} {
  func.func @_conv_section_kernel(%arg0: i32, %arg1: memref<1x8x256xf32, #tpu.memory_space<vmem>>, %arg2: memref<1x8x256xf32, #tpu.memory_space<vmem>>, %arg3: memref<8x8xf32, #tpu.memory_space<vmem>>, %arg4: memref<8x1xf32, #tpu.memory_space<vmem>>, %arg5: memref<1x256xf32, #tpu.memory_space<vmem>>, %arg6: memref<1x256xf32, #tpu.memory_space<vmem>>, %arg7: memref<8x1xf32, #tpu.memory_space<vmem>>, %arg8: memref<8x1xf32, #tpu.memory_space<vmem>>, %arg9: memref<1x8x256xf32, #tpu.memory_space<vmem>>) attributes {dimension_semantics = [#tpu.dimension_semantics<parallel>], iteration_bounds = array<i64: 2>, scalar_prefetch = 0 : i64, scratch_operands = 0 : i64, tpu.core_type = #tpu.core_type<tc>, window_params = [{transform_indices = @transform_0, window_bounds = array<i64: 1, 8, 256>}, {transform_indices = @transform_1, window_bounds = array<i64: 1, 8, 256>}, {pipeline_mode = #tpu.pipeline_mode<synchronous>, transform_indices = @transform_2, window_bounds = array<i64: 8, 8>}, {pipeline_mode = #tpu.pipeline_mode<synchronous>, transform_indices = @transform_3, window_bounds = array<i64: 8, 1>}, {pipeline_mode = #tpu.pipeline_mode<synchronous>, transform_indices = @transform_4, window_bounds = array<i64: 1, 256>}, {pipeline_mode = #tpu.pipeline_mode<synchronous>, transform_indices = @transform_5, window_bounds = array<i64: 1, 256>}, {pipeline_mode = #tpu.pipeline_mode<synchronous>, transform_indices = @transform_6, window_bounds = array<i64: 8, 1>}, {pipeline_mode = #tpu.pipeline_mode<synchronous>, transform_indices = @transform_7, window_bounds = array<i64: 8, 1>}, {transform_indices = @transform_8, window_bounds = array<i64: 1, 8, 256>}]} {
    %c0 = arith.constant 0 : index
    %c0_0 = arith.constant 0 : index
    %0 = vector.load %arg3[%c0, %c0_0] : memref<8x8xf32, #tpu.memory_space<vmem>>, vector<8x8xf32>
    %c0_1 = arith.constant 0 : index
    %c0_2 = arith.constant 0 : index
    %1 = vector.load %arg4[%c0_1, %c0_2] : memref<8x1xf32, #tpu.memory_space<vmem>>, vector<8x1xf32>
    %c0_3 = arith.constant 0 : index
    %c0_4 = arith.constant 0 : index
    %c0_5 = arith.constant 0 : index
    %2 = vector.load %arg1[%c0_3, %c0_4, %c0_5] : memref<1x8x256xf32, #tpu.memory_space<vmem>>, vector<1x8x256xf32>
    %3 = vector.shape_cast %2 : vector<1x8x256xf32> to vector<8x256xf32>
    %cst = arith.constant dense<0.000000e+00> : vector<8x256xf32>
    %4 = tpu.matmul %0, %3, %cst {dimension_numbers = #tpu.dot_dimension_numbers<[1], [0], [0], [1], [0, 0, 1, 1], [], []>} : vector<8x8xf32>, vector<8x256xf32>, vector<8x256xf32> -> vector<8x256xf32>
    %5 = vector.broadcast %1 : vector<8x1xf32> to vector<8x256xf32>
    %6 = arith.addf %4, %5 : vector<8x256xf32>
    %cst_6 = arith.constant 0.000000e+00 : f32
    %7 = vector.broadcast %cst_6 : f32 to vector<8x256xf32>
    %8 = arith.maximumf %6, %7 : vector<8x256xf32>
    %c0_7 = arith.constant 0 : index
    %c0_8 = arith.constant 0 : index
    %9 = vector.load %arg5[%c0_7, %c0_8] : memref<1x256xf32, #tpu.memory_space<vmem>>, vector<1x256xf32>
    %10 = vector.broadcast %9 : vector<1x256xf32> to vector<8x256xf32>
    %11 = arith.addf %8, %10 : vector<8x256xf32>
    %c0_9 = arith.constant 0 : index
    %c0_10 = arith.constant 0 : index
    %c0_11 = arith.constant 0 : index
    %12 = vector.load %arg2[%c0_9, %c0_10, %c0_11] : memref<1x8x256xf32, #tpu.memory_space<vmem>>, vector<1x8x256xf32>
    %13 = vector.shape_cast %12 : vector<1x8x256xf32> to vector<8x256xf32>
    %cst_12 = arith.constant dense<0.000000e+00> : vector<8x256xf32>
    %14 = tpu.matmul %0, %13, %cst_12 {dimension_numbers = #tpu.dot_dimension_numbers<[1], [0], [0], [1], [0, 0, 1, 1], [], []>} : vector<8x8xf32>, vector<8x256xf32>, vector<8x256xf32> -> vector<8x256xf32>
    %15 = vector.broadcast %1 : vector<8x1xf32> to vector<8x256xf32>
    %16 = arith.addf %14, %15 : vector<8x256xf32>
    %cst_13 = arith.constant 0.000000e+00 : f32
    %17 = vector.broadcast %cst_13 : f32 to vector<8x256xf32>
    %18 = arith.maximumf %16, %17 : vector<8x256xf32>
    %c0_14 = arith.constant 0 : index
    %c0_15 = arith.constant 0 : index
    %19 = vector.load %arg6[%c0_14, %c0_15] : memref<1x256xf32, #tpu.memory_space<vmem>>, vector<1x256xf32>
    %20 = vector.broadcast %19 : vector<1x256xf32> to vector<8x256xf32>
    %21 = arith.addf %18, %20 : vector<8x256xf32>
    %22 = arith.maximumf %11, %21 : vector<8x256xf32>
    %c0_16 = arith.constant 0 : index
    %c0_17 = arith.constant 0 : index
    %23 = vector.load %arg7[%c0_16, %c0_17] : memref<8x1xf32, #tpu.memory_space<vmem>>, vector<8x1xf32>
    %24 = vector.broadcast %23 : vector<8x1xf32> to vector<8x256xf32>
    %25 = arith.mulf %22, %24 : vector<8x256xf32>
    %c0_18 = arith.constant 0 : index
    %c0_19 = arith.constant 0 : index
    %26 = vector.load %arg8[%c0_18, %c0_19] : memref<8x1xf32, #tpu.memory_space<vmem>>, vector<8x1xf32>
    %27 = vector.broadcast %26 : vector<8x1xf32> to vector<8x256xf32>
    %28 = arith.addf %25, %27 : vector<8x256xf32>
    %c0_20 = arith.constant 0 : index
    %c0_21 = arith.constant 0 : index
    %c0_22 = arith.constant 0 : index
    %29 = vector.load %arg9[%c0_20, %c0_21, %c0_22] : memref<1x8x256xf32, #tpu.memory_space<vmem>>, vector<1x8x256xf32>
    %30 = vector.shape_cast %29 : vector<1x8x256xf32> to vector<8x256xf32>
    %31 = vector.shape_cast %28 : vector<8x256xf32> to vector<1x8x256xf32>
    tpu.vector_store %arg9[%c0_20, %c0_21, %c0_22], %31 {strides = array<i32>} : memref<1x8x256xf32, #tpu.memory_space<vmem>>, vector<1x8x256xf32>,
    return
  }
  func.func @transform_0(%arg0: i32) -> (i32, i32, i32) {
    %c0_i32 = arith.constant 0 : i32
    %c0_i32_0 = arith.constant 0 : i32
    %c0_i32_1 = arith.constant 0 : i32
    return %arg0, %c0_i32, %c0_i32_0 : i32, i32, i32
  }
  func.func @transform_1(%arg0: i32) -> (i32, i32, i32) {
    %c0_i32 = arith.constant 0 : i32
    %c0_i32_0 = arith.constant 0 : i32
    %c0_i32_1 = arith.constant 0 : i32
    return %arg0, %c0_i32, %c0_i32_0 : i32, i32, i32
  }
  func.func @transform_2(%arg0: i32) -> (i32, i32) {
    %c0_i32 = arith.constant 0 : i32
    %c0_i32_0 = arith.constant 0 : i32
    %c0_i32_1 = arith.constant 0 : i32
    return %c0_i32, %c0_i32_0 : i32, i32
  }
  func.func @transform_3(%arg0: i32) -> (i32, i32) {
    %c0_i32 = arith.constant 0 : i32
    %c0_i32_0 = arith.constant 0 : i32
    %c0_i32_1 = arith.constant 0 : i32
    return %c0_i32, %c0_i32_0 : i32, i32
  }
  func.func @transform_4(%arg0: i32) -> (i32, i32) {
    %c0_i32 = arith.constant 0 : i32
    %c0_i32_0 = arith.constant 0 : i32
    %c0_i32_1 = arith.constant 0 : i32
    return %c0_i32, %c0_i32_0 : i32, i32
  }
  func.func @transform_5(%arg0: i32) -> (i32, i32) {
    %c0_i32 = arith.constant 0 : i32
    %c0_i32_0 = arith.constant 0 : i32
    %c0_i32_1 = arith.constant 0 : i32
    return %c0_i32, %c0_i32_0 : i32, i32
  }
  func.func @transform_6(%arg0: i32) -> (i32, i32) {
    %c0_i32 = arith.constant 0 : i32
    %c0_i32_0 = arith.constant 0 : i32
    %c0_i32_1 = arith.constant 0 : i32
    return %c0_i32, %c0_i32_0 : i32, i32
  }
  func.func @transform_7(%arg0: i32) -> (i32, i32) {
    %c0_i32 = arith.constant 0 : i32
    %c0_i32_0 = arith.constant 0 : i32
    %c0_i32_1 = arith.constant 0 : i32
    return %c0_i32, %c0_i32_0 : i32, i32
  }
  func.func @transform_8(%arg0: i32) -> (i32, i32, i32) {
    %c0_i32 = arith.constant 0 : i32
    %c0_i32_0 = arith.constant 0 : i32
    %c0_i32_1 = arith.constant 0 : i32
    return %arg0, %c0_i32, %c0_i32_0 : i32, i32, i32
  }
}

</mosaic_0001>

<bundles_post_ra>
// kernel: tpu_custom_call.1
= control target key start
LH: loop header
LB: loop body
LE: loop exit
PB: predicated region body
PF: predicated region fallthrough
CT: control target
= control target key end

     0   :  { %s1049_s0 = inlined_call_operand.hbm [shape: f32[2,8,256], index: 0, kind: input, shape index: {}]   ;;  %s1050_s1 = inlined_call_operand.hbm [shape: f32[2,8,256], index: 1, kind: input, shape index: {}]   ;;  %s1051_s2 = inlined_call_operand.vmem [shape: f32[8,8], index: 2, kind: input, shape index: {}]   ;;  %s1052_s3 = inlined_call_operand.vmem [shape: f32[8,1], index: 3, kind: input, shape index: {}]   ;;  %s1053_s4 = inlined_call_operand.vmem [shape: f32[1,256], index: 4, kind: input, shape index: {}]   ;;  %s1054_s5 = inlined_call_operand.vmem [shape: f32[1,256], index: 5, kind: input, shape index: {}]   ;;  %s1055_s6 = inlined_call_operand.vmem [shape: f32[8,1], index: 6, kind: input, shape index: {}]   ;;  %s1056_s7 = inlined_call_operand.vmem [shape: f32[8,1], index: 7, kind: input, shape index: {}]   ;;  %s1057_s8 = inlined_call_operand.hbm [shape: f32[2,8,256], index: 8, kind: output, shape index: {}]  }
   0x1   :  { %1062 = sst [smem:[#allocation15_spill]] %s1049_s0 }
   0x2   :  { %13 = vsyncpa [#allocation3], 0 }
   0x3   :  { %15 = vsyncpa [#allocation3 + $0x1], 0 }
   0x4   :  { %16 = vsyncpa [#allocation6], 0 }
   0x5   :  { %18 = vsyncpa [#allocation6 + $0x1], 0 }
   0x6   :  { %19 = vsyncpa [#allocation4], 0 }
   0x7   :  { %21 = vsyncpa [#allocation4 + $0x1], 0  ;;  %s866_s27 = smov 0   ;;  %s868_s28 = smov 0  }
   0x8   :  { %s870_s29 = smov 0   ;;  %s872_s30 = smov 0  }
   0x9 LB: > { %1063 = sst [smem:[#allocation11_spill]] %s814_s29  ;;  %s887_s9 = sadd.s32 4294967295, %s818_s30   ;;  %s818_s30 = sphi %s872_s30, %s1076_s30   ;;  %s814_s29 = sphi %s870_s29, %s1078_s29   ;;  %s810_s28 = sphi %s868_s28, %s1080_s28   ;;  %s806_s27 = sphi %s866_s27, %s1079_s27  }
   0xa   : > { %s609_s10 = sadd.s32 4294967294, %s818_s30   ;;  %s891_s11 = sadd.s32 1, %s818_s30  }
   0xb   : > { %1064 = sst [smem:[#allocation12_spill]] %s891_s11  ;;  %s34_s12 = sadd.s32 1, %s814_s29 }
   0xc   : > { %s31_s13 = ssub.s32 %s818_s30, %s891_s11  ;;  %p41_p0 = scmp.ne.s32.totalorder %s814_s29, %s810_s28 }
   0xd   : > { %p32_p1 = scmp.eq.s32.totalorder %s31_s13, 0  ;;  %p42_p2 = scmp.eq.s32.totalorder %s818_s30, 0 }
   0xe   : > { %p47_p3 = scmp.ne.s32.totalorder %s810_s28, %s806_s27  ;;  %p48_p4 = scmp.eq.s32.totalorder %s887_s9, 0 }
   0xf   : > { %s903_s14 = scalar_select %p32_p1, %s814_s29, %s34_s12  }
  0x10   : > { %p905_p5 = por %p42_p2, %p41_p0  ;;  %p909_p6 = por %p48_p4, %p47_p3 }
  0x11   : > { %1065 = sst [smem:[#allocation13_spill]] %s903_s14  ;;  %p223_p7 = scmp.eq.s32.totalorder %s887_s9, 1 }
  0x12   : > { %p229_p8 = scmp.eq.s32.totalorder %s609_s10, 1  ;;  %p651_p10 = scmp.lt.s32.totalorder %s818_s30, 2 }
  0x13   : > { %p916_p11 = por %p223_p7, %p41_p0  ;;  %s925_s19 = sand.u32 1, %s814_s29  }
  0x14   : > { %p920_p12 = por %p229_p8, %p47_p3  ;;  %s631_s20 = sshll.u32 %s818_s30, 4 }
  0x15   : > { %s612_s21 = sshll.u32 %s925_s19, 4  ;;  %s1071_s0 = sld [smem:[#allocation15_spill]] }
  0x16   : > { %s1069_s18 = scalar_select %p920_p12, 1, 0 }
  0x17   : > { %s271_s26 = scalar_lea.vmem [#allocation2], %s612_s21  ;;  %p934_p13 = pnand %p651_p10, %p905_p5 }
  0x18   : > { %1070 = sst [smem:[#allocation14_spill]] %s1069_s18  ;;  %s280_s10 = sshll.u32 %s271_s26, 4  ;;  %s281_s10 = int_to_ptr.vmem [resolvable:$true] %s280_s10 }
  0x19   : > { %p618_p0 = scmp.ge.s32.totalorder %s818_s30, 1  ;;  %p305_p1 = scmp.lt.s32.totalorder %s818_s30, 3 }
  0x1a   : > { %s268_s13 = scalar_lea.sflag [#allocation3], %s925_s19  ;;  %p692_p3 = pneg %p934_p13 }
  0x1b   : > { %s276_s24 = scalar_lea.hbm %s1071_s0, %s631_s20  ;;  %s695_s23 = scalar_lea.hbm %s1071_s0, 32 }
  0x1c   : > { %s278_s25 = sshll.u32 %s276_s24, 4  ;;  %s279_s25 = int_to_ptr.hbm [resolvable:$true] %s278_s25 }
  0x1d   : > { %s688_s14 = sshra.s32 %s279_s25, 4  ;;  %s689_s14 = int_to_ptr.hbm [resolvable:$true] %s688_s14 }
  0x1e   : > { %s690_s29 = scalar_lea.hbm %s689_s14, 16  ;;  %p696_p5 = scmp.lt.s32.totalorder %s689_s14, %s1071_s0 }
  0x1f   : > { %p691_p2 = scmp.ne.s32.totalorder %s689_s14, %s690_s29  ;;  %p697_p8 = scmp.lt.s32.totalorder %s695_s23, %s690_s29 }
  0x21   : > { %p693_p4 = pnand %p692_p3, %p691_p2  ;;  %p698_p10 = por %p697_p8, %p696_p5 }
  0x23   : > { %p694_p7 = pneg %p693_p4 }
  0x25   : > { %p699_p9 = pnand %p698_p10, %p694_p7 }
  0x27   : > { %702 = shalt.err (!%p699_p9)
}
  0x28   : > { %643 = dma.hbm_to_vmem [thread:$0]  (!%p934_p13), %s279_s25, 256, %s281_s10, %s268_s13  }
  0x29   : > { %p958_p2 = pnand %p618_p0, %p305_p1  ;;  %s296_s29 = scalar_lea.hbm %s1050_s1, %s631_s20 }
  0x2a   : > { %s298_s14 = sshll.u32 %s296_s29, 4  ;;  %s291_s23 = scalar_lea.vmem [#allocation5], %s612_s21  ;;  %s299_s14 = int_to_ptr.hbm [resolvable:$true] %s298_s14 }
  0x2b   : > { %s300_s26 = sshll.u32 %s291_s23, 4  ;;  %s288_s0 = scalar_lea.sflag [#allocation6], %s925_s19  ;;  %s301_s26 = int_to_ptr.vmem [resolvable:$true] %s300_s26 }
  0x2c   : > { %s718_s11 = sshra.s32 %s299_s14, 4  ;;  %s725_s13 = scalar_lea.hbm %s1050_s1, 32  ;;  %s719_s11 = int_to_ptr.hbm [resolvable:$true] %s718_s11 }
  0x2d   : > { %s720_s18 = scalar_lea.hbm %s719_s11, 16  ;;  %p726_p4 = scmp.lt.s32.totalorder %s719_s11, %s1050_s1 }
  0x2e   : > { %p721_p9 = scmp.ne.s32.totalorder %s719_s11, %s720_s18  ;;  %p727_p7 = scmp.lt.s32.totalorder %s725_s13, %s720_s18 }
  0x30   : > { %p723_p0 = pnand %p721_p9, %p692_p3  ;;  %p728_p5 = por %p727_p7, %p726_p4 }
  0x32   : > { %p724_p1 = pneg %p723_p0 }
  0x34   : > { %p729_p8 = pnand %p728_p5, %p724_p1 }
  0x36   : > { %732 = shalt.err (!%p729_p8)
}
  0x37   : > { %646 = dma.hbm_to_vmem [thread:$0]  (!%p934_p13), %s299_s14, 256, %s301_s26, %s288_s0  }
  0x38   : > { %309 = sbr.rel (%p958_p2) target bundleno = 215 (0xd7), region = 52  ;;  %s980_s19 = sand.u32 (!%p958_p2), 1, %s810_s28  }
  0x39   : > { %s983_s21 = sshll.u32 (!%p958_p2), %s980_s19, 4  ;;  %s312_s11 = scalar_lea.sflag (!%p958_p2), [#allocation3], %s980_s19 }
  0x3a   : > { %s315_s18 = scalar_lea.vmem (!%p958_p2), [#allocation2], %s983_s21 }
  0x3d   : > { %793 = dma.done.wait (%p909_p6), %s312_s11, 256  }
  0x3e   : > { %795 = vsyncadd (%p909_p6), %s312_s11, 4294967040  ;;  %s322_s0 = scalar_lea.sflag [#allocation6], %s980_s19  ;;  %s325_s12 = scalar_lea.vmem [#allocation5], %s983_s21 }
  0x3f   : > { %797 = dma.done.wait (%p909_p6), %s322_s0, 256  }
  0x40   : > { %799 = vsyncadd (%p909_p6), %s322_s0, 4294967040  ;;  %v820_v0 = vmov 0   ;;  %vm373_vm0 = vcmask 64512   ;;  %v427_v1 = vld [vmem:[%s325_s12] sm:$0xff]  ;;  %v428_v2 = vld [vmem:[%s325_s12 + $0x8] sm:$0xff]  ;;  %s633_s11 = sshll.u32 %s887_s9, 4 }
  0x41   : > { %686 = vset.pattern.permute.xlu0 %v820_v0  ;;  %687 = vset.pattern.permute.xlu1 %v820_v0  ;;  %v364_v3 = vld [vmem:[%s1051_s2] sm:$0xff]  ;;  %v367_v5 = vld [vmem:[%s315_s18 + $0x8] sm:$0xff]  ;;  %s511_s12 = scalar_lea.hbm %s1057_s8, %s633_s11  ;;  %s363_s15 = scalar_lea.vmem [#allocation7], %s983_s21 }
  0x42   : > { %444 = vmatpush.msra.mxu2 %v427_v1  ;;  %464 = vmatpush.msra.mxu3 %v428_v2  ;;  %v366_v4 = vld [vmem:[%s315_s18] sm:$0xff]  ;;  %s513_s24 = sshll.u32 %s363_s15, 4  ;;  %s515_s29 = sshll.u32 %s511_s12, 4  ;;  %s514_s24 = int_to_ptr.vmem [resolvable:$true] %s513_s24  ;;  %s516_s29 = int_to_ptr.hbm [resolvable:$true] %s515_s29 }
  0x43   : > { %624 = vmatmul.msk.f32.vlgmr.msra.gmra.mxu2 %vm373_vm0, %v364_v3  ;;  %625 = vmatmul.msk.f32.vlgmr.msra.gmra.mxu3 %vm373_vm0, %v364_v3  ;;  %v365_v6 = vld [vmem:[%s1052_s3] sm:$0xff]  ;;  %s500_s9 = scalar_lea.sflag [#allocation4], %s980_s19  ;;  %s762_s14 = sshra.s32 %s516_s29, 4  ;;  %s763_s14 = int_to_ptr.hbm [resolvable:$true] %s762_s14 }
  0x44   : > { %v489_v7 = vld [vmem:[%s1056_s7] sm:$0xff]  ;;  %392 = vmatpush.msra.mxu0 %v366_v4  ;;  %412 = vmatpush.msra.mxu1 %v367_v5  ;;  %s764_s16 = scalar_lea.hbm %s763_s14, 16  ;;  %s768_s21 = scalar_lea.hbm %s1057_s8, 32 }
  0x45   : > { %622 = vmatmul.msk.f32.vlgmr.msra.gmra.mxu0 %vm373_vm0, %v364_v3  ;;  %623 = vmatmul.msk.f32.vlgmr.msra.gmra.mxu1 %vm373_vm0, %v364_v3  ;;  %v481_v8 = vld [vmem:[%s1055_s6] sm:$0xff]  ;;  %p765_p6 = scmp.ne.s32.totalorder %s763_s14, %s764_s16  ;;  %p769_p10 = scmp.lt.s32.totalorder %s763_s14, %s1057_s8 }
  0x46   : > { %370 = vperm.xlu0 %686, %v365_v6   ;;  %492 = vperm.xlu1 %687, %v489_v7   ;;  %v419_v11 = vld [vmem:[%s1053_s4] sm:$0x3]  ;;  %p770_p2 = scmp.lt.s32.totalorder %s768_s21, %s764_s16 }
  0x47   : > { %v471_v15 = vld [vmem:[%s1054_s5] sm:$0x3]  ;;  %v421_v17 = vperm.slane %v419_v11, 0  ;;  %v422_v19 = vperm.slane %v419_v11, 1  ;;  %p766_p13 = pnand %p765_p6, %p916_p11 }
  0x48   : > { %v473_v23 = vperm.slane %v471_v15, 0  ;;  %v474_v25 = vperm.slane %v471_v15, 1  ;;  %p771_p9 = por %p770_p2, %p769_p10 }
  0x49   : > { %p767_p3 = pneg %p766_p13 }
  0x4b   : > { %p772_p0 = pnand %p771_p9, %p767_p3 }
  0x4e   : > { %484 = vperm.xlu0 %686, %v481_v8  }
  0xb8   : > { %v371_v9 = vpop.permute.xlu0 %370  ;;  %v493_v35 = vpop.permute.xlu1 %492 }
  0xc0   : > { %v485_v34 = vpop.permute.xlu0 %484 }
  0xc2   : > { %v394_v10 = vpop.f32.mrf.mxu0  ;;  %v414_v12 = vpop.f32.mrf.mxu1 }
  0xc3   : > { %v395_v13 = vadd.f32 %v394_v10, %v371_v9  ;;  %v415_v14 = vadd.f32 %v414_v12, %v371_v9 }
  0xc5   : > { %v417_v16 = vmax.f32 %v395_v13, 0.0  ;;  %v418_v18 = vmax.f32 %v415_v14, 0.0 }
  0xc6   : > { %v446_v20 = vpop.f32.mrf.mxu2  ;;  %v466_v21 = vpop.f32.mrf.mxu3 }
  0xc7   : > { %v447_v22 = vadd.f32 %v446_v20, %v371_v9  ;;  %v467_v24 = vadd.f32 %v466_v21, %v371_v9  ;;  %v425_v26 = vadd.f32 %v421_v17, %v417_v16  ;;  %v426_v27 = vadd.f32 %v422_v19, %v418_v18 }
  0xc9   : > { %v469_v28 = vmax.f32 %v447_v22, 0.0  ;;  %v470_v29 = vmax.f32 %v467_v24, 0.0 }
  0xcb   : > { %v477_v30 = vadd.f32 %v473_v23, %v469_v28  ;;  %v478_v31 = vadd.f32 %v474_v25, %v470_v29 }
  0xcd   : > { %v479_v32 = vmax.f32 %v425_v26, %v477_v30  ;;  %v480_v33 = vmax.f32 %v426_v27, %v478_v31 }
  0xcf   : > { %v487_v36 = vmul.f32 %v485_v34, %v479_v32  ;;  %v488_v37 = vmul.f32 %v485_v34, %v480_v33 }
  0xd1   : > { %v495_v38 = vadd.f32 %v493_v35, %v487_v36  ;;  %v496_v39 = vadd.f32 %v493_v35, %v488_v37 }
  0xd3   : > { %497 = vst [vmem:[%s363_s15] sm:$0xff] %v495_v38 }
  0xd4   : > { %498 = vst [vmem:[%s363_s15 + $0x8] sm:$0xff] %v496_v39 }
  0xd5   : > { %775 = shalt.err (!%p772_p0)
}
  0xd6   : > { %638 = dma.vmem_to_hbm [thread:$0]  (%p916_p11), %s514_s24, 256, %s516_s29, %s500_s9  }
  0xd7 PF: > { %s527_s13 = sand.u32 1, %s806_s27   ;;  %p1075_p1 = scmp.ge.s32.totalorder %s818_s30, 2 }
  0xd8   : > { %s528_s22 = scalar_lea.sflag [#allocation4], %s527_s13 }
  0xd9   : > { %p648_p4 = pnand %p1075_p1, %p920_p12 }
  0xdb   : > { %p649_p7 = pneg %p648_p4 }
  0xdd   : > { %801 = dma.done.wait (%p649_p7), %s528_s22, 256  }
  0xde   : > { %803 = vsyncadd (%p649_p7), %s528_s22, 4294967040  ;;  %s1076_s30 = sld [smem:[#allocation12_spill]]  ;;  %s1079_s27 = smov %s810_s28 }
  0xdf   : > { %s1077_s20 = sld [smem:[#allocation11_spill]] }
  0xe0   : > { %s1078_s29 = sld [smem:[#allocation13_spill]] }
  0xe4   : > { %p24_p5 = scmp.ge.s32.totalorder %s1076_s30, 4  }
  0xe5   : > { %s1080_s28 = smov %s1077_s20 }
  0xe6   :  { %26 = sbr.rel (!%p24_p5) target bundleno = 9 (0x9), region = 110 }
  0xeb   :  { %534 = vsyncpa [#allocation3], 1 }
  0xec   :  { %536 = vsyncpa [#allocation3 + $0x1], 1 }
  0xed   :  { %537 = vsyncpa [#allocation6], 1 }
  0xee   :  { %539 = vsyncpa [#allocation6 + $0x1], 1 }
  0xef   :  { %540 = vsyncpa [#allocation4], 1 }
  0xf0   :  { %542 = vsyncpa [#allocation4 + $0x1], 1 }

</bundles_post_ra>
